<compile_context>
chip_gen: v6e
topology: v6e:2x2x1
jax: 0.10.0
libtpu: 0.0.40
codegen_flags: <defaults>
</compile_context>

<pallas_src>
import math

import jax
import jax.numpy as jnp
from jax.experimental import pallas as pl
from jax.experimental.pallas import tpu as pltpu


def _eca_kernel_size(channel: int, gamma: int = 2, b: int = 1) -> int:
    k = int(abs((math.log(channel, 2) + b) / gamma))
    k = k if k % 2 else k + 1
    return k


def _conv_band_matrix(conv_weight: jax.Array, channels: int, inv_hw: float) -> jax.Array:
    """(C, C) matrix M with conv[b, c] = sum_j sums[b, j] * M[j, c].

    Equivalent to Conv1d(1, 1, K, padding=K//2, bias=False) applied over the
    channel axis of the global-average-pooled features, with the 1/(H*W) mean
    normalization folded into the weights (zero padding handled by `valid`).
    """
    K = conv_weight.shape[0]
    pad = K // 2
    j = jnp.arange(channels)[:, None]          # input channel (contracted)
    c = jnp.arange(channels)[None, :]          # output channel
    tap = j - c + pad                          # which conv tap connects j -> c
    valid = (tap >= 0) & (tap < K)
    w = jnp.where(valid, conv_weight[jnp.clip(tap, 0, K - 1)], 0.0)
    return (w * inv_hw).astype(jnp.float32)


def _eca_kernel(x_ref, band_ref, o_ref):
    # x_ref    : VMEM (Bt, C, HW)   tile of the input, native dtype
    # band_ref : VMEM (C, C) f32    banded conv matrix (resident across steps)
    # o_ref    : VMEM (Bt, C, HW)
    x = x_ref[...]                                            # native dtype

    # Global average pool over spatial dims; 1/HW is folded into band_ref.
    # Accumulate in f32 without materializing an f32 copy of the whole tile.
    sums = jnp.sum(x, axis=-1, dtype=jnp.float32)             # (Bt, C) f32

    # 1-D channel conv with zero padding as a single small MXU matmul.
    conv = jnp.dot(sums, band_ref[...],
                   preferred_element_type=jnp.float32)        # (Bt, C) f32

    # Sigmoid gate (EUP), then channel-wise rescale of x in its native dtype.
    scale = jax.nn.sigmoid(conv).astype(x.dtype)              # (Bt, C)
    o_ref[...] = (x * scale[:, :, None]).astype(o_ref.dtype)


def eca_forward(x_nchw: jax.Array, conv_weight: jax.Array) -> jax.Array:
    """x_nchw: (B, C, H, W).  conv_weight: (K,) Conv1d(1,1,K) weight."""
    B, C, H, W = x_nchw.shape
    HW = H * W
    x = x_nchw.reshape(B, C, HW)
    band = _conv_band_matrix(conv_weight.astype(jnp.float32), C, 1.0 / HW)

    # --- pick the batch tile: ~4 MiB blocks (well past the roofline knee),
    # --- but keep >= 2 grid steps when B >= 2 so both TensorCores get work.
    bytes_per_batch = C * HW * x.dtype.itemsize
    target_block_bytes = 4 * 1024 * 1024
    bt = max(1, min(B, target_block_bytes // max(1, bytes_per_batch)))
    if B >= 2:
        bt = min(bt, (B + 1) // 2)
    grid = (pl.cdiv(B, bt),)

    out = pl.pallas_call(
        _eca_kernel,
        out_shape=jax.ShapeDtypeStruct((B, C, HW), x.dtype),
        grid_spec=pltpu.PrefetchScalarGridSpec(
            num_scalar_prefetch=0,
            grid=grid,
            in_specs=[
                # one (Bt, C, HW) slab of x per grid step
                pl.BlockSpec((bt, C, HW), lambda b: (b, 0, 0)),
                # banded conv matrix: constant block index -> fetched once,
                # stays resident in VMEM across all grid steps
                pl.BlockSpec((C, C), lambda b: (0, 0)),
            ],
            out_specs=pl.BlockSpec((bt, C, HW), lambda b: (b, 0, 0)),
        ),
        compiler_params=pltpu.CompilerParams(
            dimension_semantics=("parallel",),
            # ~4 MiB blocks double-buffered in+out (~16 MiB) plus the band
            # matrix; 48 MiB headroom is safe on v5e/v6e and within v7x VMEM.
            vmem_limit_bytes=48 * 1024 * 1024,
        ),
        cost_estimate=pl.CostEstimate(
            flops=3 * B * C * HW,            # reduce + scale (+ tiny conv)
            transcendentals=B * C,           # sigmoid
            bytes_accessed=2 * B * C * HW * x.dtype.itemsize,
        ),
    )(x, band)
    return out.reshape(B, C, H, W)


def eca_reference(x_nchw: jax.Array, conv_weight: jax.Array) -> jax.Array:
    """Pure-JAX reference mirroring the PyTorch forward."""
    B, C, H, W = x_nchw.shape
    K = conv_weight.shape[0]
    pad = K // 2
    avg = jnp.mean(x_nchw, axis=(2, 3))                       # (B, C)
    avg_p = jnp.pad(avg, ((0, 0), (pad, pad)))                # zero pad channels
    conv = jnp.zeros_like(avg)
    for i in range(K):
        conv = conv + conv_weight[i] * avg_p[:, i:i + C]
    scale = jax.nn.sigmoid(conv)[:, :, None, None]            # (B, C, 1, 1)
    return scale * x_nchw


if __name__ == "__main__":
    # Small shapes consistent with the module: batch=2, channels=16, spatial
    # 16x16 -> adaptive kernel_size = 3, padding = 1 (ECA kernel-size rule).
    B, C, H, W = 2, 16, 16, 16
    K = _eca_kernel_size(C)

    key = jax.random.PRNGKey(0)
    kx, kw = jax.random.split(key)
    x = jax.random.normal(kx, (B, C, H, W), dtype=jnp.float32)

    # Deterministic Conv1d(1,1,K,bias=False) weight (kaiming-uniform style bound).
    bound = 1.0 / math.sqrt(K)
    conv_w = jax.random.uniform(kw, (K,), minval=-bound, maxval=bound,
                                dtype=jnp.float32)

    y = jax.block_until_ready(eca_forward(x, conv_w))
    y_ref = eca_reference(x, conv_w)

    assert y.shape == (B, C, H, W)
    assert jnp.allclose(y, y_ref, atol=1e-4, rtol=1e-5), "mismatch vs reference"

    print("KERNEL_OK")
</pallas_src>

<mosaic_0001>
module attributes {stable_mosaic.version = 11 : i64} {
  func.func @_eca_kernel(%arg0: i32, %arg1: memref<1x16x256xf32, #tpu.memory_space<vmem>>, %arg2: memref<16x16xf32, #tpu.memory_space<vmem>>, %arg3: memref<1x16x256xf32, #tpu.memory_space<vmem>>) attributes {dimension_semantics = [#tpu.dimension_semantics<parallel>], iteration_bounds = array<i64: 2>, scalar_prefetch = 0 : i64, scratch_operands = 0 : i64, tpu.core_type = #tpu.core_type<tc>, window_params = [{transform_indices = @transform_0, window_bounds = array<i64: 1, 16, 256>}, {pipeline_mode = #tpu.pipeline_mode<synchronous>, transform_indices = @transform_1, window_bounds = array<i64: 16, 16>}, {transform_indices = @transform_2, window_bounds = array<i64: 1, 16, 256>}]} {
    %c0 = arith.constant 0 : index
    %c0_0 = arith.constant 0 : index
    %c0_1 = arith.constant 0 : index
    %0 = vector.load %arg1[%c0, %c0_0, %c0_1] : memref<1x16x256xf32, #tpu.memory_space<vmem>>, vector<1x16x256xf32>
    %cst = arith.constant dense<0.000000e+00> : vector<1x16xf32>
    %1 = vector.multi_reduction <add>, %0, %cst [2] : vector<1x16x256xf32> to vector<1x16xf32>
    %c0_2 = arith.constant 0 : index
    %c0_3 = arith.constant 0 : index
    %2 = vector.load %arg2[%c0_2, %c0_3] : memref<16x16xf32, #tpu.memory_space<vmem>>, vector<16x16xf32>
    %cst_4 = arith.constant dense<0.000000e+00> : vector<1x16xf32>
    %3 = tpu.matmul %1, %2, %cst_4 {dimension_numbers = #tpu.dot_dimension_numbers<[1], [0], [0], [1], [0, 0, 1, 1], [], []>} : vector<1x16xf32>, vector<16x16xf32>, vector<1x16xf32> -> vector<1x16xf32>
    %4 = arith.negf %3 : vector<1x16xf32>
    %5 = math.exp %4 : vector<1x16xf32>
    %cst_5 = arith.constant 1.000000e+00 : f32
    %6 = vector.broadcast %cst_5 : f32 to vector<1x16xf32>
    %7 = arith.addf %6, %5 : vector<1x16xf32>
    %8 = arith.divf %6, %7 : vector<1x16xf32>
    %9 = vector.shape_cast %8 : vector<1x16xf32> to vector<1x16x1xf32>
    %10 = vector.broadcast %9 : vector<1x16x1xf32> to vector<1x16x256xf32>
    %11 = arith.mulf %0, %10 : vector<1x16x256xf32>
    %c0_6 = arith.constant 0 : index
    %c0_7 = arith.constant 0 : index
    %c0_8 = arith.constant 0 : index
    %12 = vector.load %arg3[%c0_6, %c0_7, %c0_8] : memref<1x16x256xf32, #tpu.memory_space<vmem>>, vector<1x16x256xf32>
    tpu.vector_store %arg3[%c0_6, %c0_7, %c0_8], %11 {strides = array<i32>} : memref<1x16x256xf32, #tpu.memory_space<vmem>>, vector<1x16x256xf32>,
    return
  }
  func.func @transform_0(%arg0: i32) -> (i32, i32, i32) {
    %c0_i32 = arith.constant 0 : i32
    %c0_i32_0 = arith.constant 0 : i32
    %c0_i32_1 = arith.constant 0 : i32
    return %arg0, %c0_i32, %c0_i32_0 : i32, i32, i32
  }
  func.func @transform_1(%arg0: i32) -> (i32, i32) {
    %c0_i32 = arith.constant 0 : i32
    %c0_i32_0 = arith.constant 0 : i32
    %c0_i32_1 = arith.constant 0 : i32
    return %c0_i32, %c0_i32_0 : i32, i32
  }
  func.func @transform_2(%arg0: i32) -> (i32, i32, i32) {
    %c0_i32 = arith.constant 0 : i32
    %c0_i32_0 = arith.constant 0 : i32
    %c0_i32_1 = arith.constant 0 : i32
    return %arg0, %c0_i32, %c0_i32_0 : i32, i32, i32
  }
}

</mosaic_0001>

<bundles_post_ra>
// kernel: tpu_custom_call.1
= control target key start
LH: loop header
LB: loop body
LE: loop exit
PB: predicated region body
PF: predicated region fallthrough
CT: control target
= control target key end

     0   :  { %7 = vsyncpa [#allocation3], 0  ;;  %s829_s0 = inlined_call_operand.hbm [shape: f32[2,16,256], index: 0, kind: input, shape index: {}]   ;;  %s830_s1 = inlined_call_operand.hbm [shape: f32[16,16], index: 1, kind: input, shape index: {}]   ;;  %s831_s2 = inlined_call_operand.hbm [shape: f32[2,16,256], index: 2, kind: output, shape index: {}]  }
   0x1   :  { %9 = vsyncpa [#allocation3 + $0x1], 0 }
   0x2   :  { %10 = vsyncpa [#allocation6], 0 }
   0x3   :  { %11 = vsyncpa [#allocation4], 0 }
   0x4   :  { %13 = vsyncpa [#allocation4 + $0x1], 0  ;;  %s648_s9 = smov 0   ;;  %s650_s10 = smov 0  }
   0x5   :  { %s652_s11 = smov 0   ;;  %s654_s12 = smov 0  }
   0x6 LB: > { %s669_s13 = sadd.s32 4294967295, %s620_s12   ;;  %s399_s14 = sadd.s32 4294967294, %s620_s12   ;;  %s620_s12 = sphi %s654_s12, %s853_s12   ;;  %s616_s11 = sphi %s652_s11, %s852_s11   ;;  %s612_s10 = sphi %s650_s10, %s851_s10   ;;  %s608_s9 = sphi %s648_s9, %s850_s9  }
   0x7   : > { %p39_p0 = scmp.ne.s32.totalorder %s612_s10, %s608_s9  ;;  %p832_p1 = scmp.eq.s32.totalorder %s669_s13, 0 }
   0x8   : > { %p90_p3 = scmp.eq.s32.totalorder %s399_s14, 1  ;;  %p400_p5 = scmp.ge.s32.totalorder %s620_s12, 1 }
   0x9   : > { %p678_p4 = por %p832_p1, %p39_p0  ;;  %p97_p7 = scmp.lt.s32.totalorder %s620_s12, 3 }
   0xa   : > { %p683_p6 = por %p90_p3, %p39_p0  ;;  %s622_s18 = smov [#allocation5]  }
   0xb   : > { %s836_s15 = scalar_select %p678_p4, 1, 0 }
   0xc   : > { %s837_s16 = scalar_select %p683_p6, 1, 0 }
   0xd   : > { %p688_p8 = pnand %p400_p5, %p97_p7  ;;  %s109_s19 = sshll.u32 %s622_s18, 4  ;;  %s110_s19 = int_to_ptr.vmem [resolvable:$true] %s109_s19 }
   0xe   : > { %s702_s21 = sadd.s32 1, %s620_s12   ;;  %s26_s22 = sadd.s32 1, %s616_s11 }
   0xf   : > { %s838_s17 = scalar_select %p688_p8, 1, 0 }
  0x10   : > { %p437_p9 = pneg %p688_p8  ;;  %s23_s23 = ssub.s32 %s620_s12, %s702_s21 }
  0x11   : > { %s509_s24 = scalar_lea.vmem %s110_s19, 256  ;;  %p517_p5 = scmp.lt.s32.totalorder %s110_s19, %s110_s19 }
  0x12   : > { %p697_p11 = pnand %p437_p9, %p832_p1  ;;  %p510_p13 = scmp.ne.s32.totalorder %s110_s19, %s509_s24 }
  0x13   : > { %p518_p7 = scmp.lt.s32.totalorder %s509_s24, %s509_s24 }
  0x14   : > { %p500_p12 = pneg %p697_p11 }
  0x15   : > { %p519_p10 = por %p518_p7, %p517_p5 }
  0x16   : > { %p512_p0 = pnand %p510_p13, %p500_p12 }
  0x18   : > { %p513_p3 = pneg %p512_p0 }
  0x1a   : > { %p520_p2 = pnand %p519_p10, %p513_p3 }
  0x1c   : > { %523 = shalt.err (!%p520_p2)
}
  0x1d   : > { %s623_s25 = smov 128   ;;  %s624_s26 = smov 8  }
  0x1e   : > { %440 = dma.hbm_to_vmem [thread:$0]  (!%p697_p11), %s830_s1, 256, %s110_s19, [#allocation6], %s623_s25, %s623_s25, %s624_s26  }
  0x1f   : > { %p24_p9 = scmp.eq.s32.totalorder %s23_s23, 0  ;;  %p33_p12 = scmp.ne.s32.totalorder %s616_s11, %s612_s10 }
  0x20   : > { %p34_p10 = scmp.eq.s32.totalorder %s620_s12, 0  ;;  %p450_p2 = scmp.lt.s32.totalorder %s620_s12, 2 }
  0x21   : > { %s719_s29 = scalar_select %p24_p9, %s616_s11, %s26_s22  }
  0x22   : > { %p35_p13 = por %p34_p10, %p33_p12  ;;  %p840_p0 = scmp.eq.s32.totalorder %s669_s13, 1 }
  0x23   : > { %s123_s3 = sand.u32 1, %s616_s11   ;;  %s417_s4 = sshll.u32 %s620_s12, 9 }
  0x24   : > { %p723_p3 = por %p840_p0, %p33_p12  ;;  %s403_s5 = sshll.u32 %s123_s3, 5 }
  0x25   : > { %s732_s8 = scalar_lea.hbm %s829_s0, %s417_s4  ;;  %s127_s14 = scalar_lea.vmem [#allocation2], %s403_s5 }
  0x26   : > { %s841_s30 = scalar_select %p723_p3, 1, 0 }
  0x27   : > { %s134_s18 = sshll.u32 %s127_s14, 4  ;;  %p734_p11 = pnand %p450_p2, %p35_p13  ;;  %s738_s18 = int_to_ptr.vmem [resolvable:$true] %s134_s18 }
  0x28   : > { %s740_s20 = scalar_lea.sflag [#allocation3], %s123_s3  ;;  %s524_s22 = scalar_lea.hbm %s732_s8, 512 }
  0x29   : > { %p525_p5 = scmp.ne.s32.totalorder %s732_s8, %s524_s22  ;;  %p526_p7 = pneg %p734_p11 }
  0x2a   : > { %s529_s25 = scalar_lea.hbm %s829_s0, 1024  ;;  %p530_p10 = scmp.lt.s32.totalorder %s732_s8, %s829_s0 }
  0x2b   : > { %p527_p9 = pnand %p526_p7, %p525_p5  ;;  %p531_p2 = scmp.lt.s32.totalorder %s529_s25, %s524_s22 }
  0x2d   : > { %p528_p12 = pneg %p527_p9  ;;  %p532_p13 = por %p531_p2, %p530_p10 }
  0x2f   : > { %p533_p0 = pnand %p532_p13, %p528_p12 }
  0x31   : > { %536 = shalt.err (!%p533_p0)
}
  0x32   : > { %s537_s28 = scalar_lea.vmem %s738_s18, 512  ;;  %s625_s3 = smov [#allocation2]  }
  0x33   : > { %p538_p1 = scmp.ne.s32.totalorder %s738_s18, %s537_s28  ;;  %s542_s4 = sshll.u32 %s625_s3, 4  ;;  %s543_s4 = int_to_ptr.vmem [resolvable:$false] %s542_s4 }
  0x34   : > { %s544_s5 = scalar_lea.vmem %s543_s4, 1024  ;;  %p545_p9 = scmp.lt.s32.totalorder %s738_s18, %s543_s4 }
  0x35   : > { %p540_p6 = pnand %p538_p1, %p526_p7  ;;  %p546_p3 = scmp.lt.s32.totalorder %s544_s5, %s537_s28 }
  0x37   : > { %p541_p5 = pneg %p540_p6  ;;  %p547_p4 = por %p546_p3, %p545_p9 }
  0x39   : > { %p548_p8 = pnand %p547_p4, %p541_p5 }
  0x3b   : > { %551 = shalt.err (!%p548_p8)
}
  0x3c   : > { %s626_s6 = smov 256   ;;  %s627_s7 = smov 16  }
  0x3d   : > { %444 = dma.hbm_to_vmem [thread:$0]  (!%p734_p11), %s732_s8, 512, %s738_s18, %s740_s20, %s626_s6, %s626_s6, %s627_s7  }
  0x3e   : > { %p843_p1 = scmp.ne.s32.totalorder %s838_s17, 0 }
  0x3f   : > { %s764_s14 = sand.u32 (!%p843_p1), 1, %s612_s10   ;;  %p844_p4 = scmp.ne.s32.totalorder (!%p843_p1), %s836_s15, 0 }
  0x40   : > { %146 = sbr.rel (%p843_p1) target bundleno = 583 (0x247), region = 28  ;;  %s407_s22 = sshll.u32 (!%p843_p1), %s764_s14, 5 }
  0x41   : > { %s149_s23 = scalar_lea.sflag (!%p843_p1), [#allocation3], %s764_s14  ;;  %s152_s24 = scalar_lea.vmem (!%p843_p1), [#allocation2], %s407_s22 }
  0x45   : > { %595 = dma.done.wait (%p844_p4), %s149_s23, 512  }
  0x46   : > { %597 = vsyncadd (%p844_p4), %s149_s23, 4294966784  ;;  %p845_p6 = scmp.eq.s32.totalorder %s669_s13, 0 }
  0x48   : > { %599 = dma.done.wait (%p845_p6), [#allocation6], 256   ;;  %p846_p8 = pmov %p845_p6 }
  0x49   : > { %v177_v0 = vld [vmem:[%s152_s24] sm:$0xff]  ;;  %v178_v1 = vld [vmem:[%s152_s24 + $0x8] sm:$0xff]  ;;  %v179_v2 = vld [vmem:[%s152_s24 + $0x10] sm:$0xff]  ;;  %v628_v6 = vmov 0.0   ;;  %vm629_vm0 = vmmov 0   ;;  %v191_v9 = vlaneseq  ;;  %vm202_vm1 = vcmask 130112  }
  0x4a   : > { %601 = vsyncadd (%p846_p8), [#allocation6], 4294967040  ;;  %v181_v3 = vadd.f32 %v178_v1, %v177_v0  ;;  %v180_v4 = vld [vmem:[%s152_s24 + $0x18] sm:$0xff]  ;;  %422 = vmatprep.subr.mxu0 %v628_v6  ;;  %v188_v7 = vld [vmem:[#allocation5 + $0x8] sm:$0xff]  ;;  %426 = vmatprep.mubr.msk.f32.mxu0 %vm629_vm0, %v628_v6  ;;  %vm204_vm2 = vcmask 130048   ;;  %s176_s15 = scalar_lea.vmem [#allocation7], %s407_s22 }
  0x4b   : > { %v184_v5 = vadd.f32 %v180_v4, %v179_v2  ;;  %423 = vmatpush3.msra.mxu0 %v188_v7  ;;  %v187_v8 = vld [vmem:[#allocation5] sm:$0xff]  ;;  %v192_v10 = vand.u32 127, %v191_v9  ;;  %v194_v11 = vshrl.u32 %v191_v9, 7  ;;  %s316_s17 = sshll.u32 %s176_s15, 4  ;;  %s418_s8 = sshll.u32 %s669_s13, 9  ;;  %s781_s17 = int_to_ptr.vmem [resolvable:$true] %s316_s17 }
  0x4c   : > { %182 = vadd.xlane.f32.xlu0 %v181_v3  ;;  %424 = vmatprep.subr.mxu0 %v628_v6  ;;  %s786_s20 = scalar_lea.hbm %s831_s2, %s418_s8  ;;  %s303_s25 = scalar_lea.sflag [#allocation4], %s764_s14 }
  0x4d   : > { %425 = vmatpush3.msra.mxu0 %v187_v8  ;;  %v197_v12 = vadd.s32 4294967288, %v192_v10  ;;  %v195_v14 = vsub.s32 %v192_v10, %v194_v11  ;;  %v285_v25 = vsub.s32 0, %v194_v11  ;;  %s552_s26 = scalar_lea.vmem %s781_s17, 512  ;;  %p847_p11 = scmp.ne.s32.totalorder %s841_s30, 0 }
  0x4e   : > { %p553_p3 = scmp.ne.s32.totalorder %s781_s17, %s552_s26  ;;  %s630_s13 = smov [#allocation7]  }
  0x4f   : > { %v200_v15 = vsub.s32 %v197_v12, %v194_v11  ;;  %s556_s27 = sshll.u32 %s630_s13, 4  ;;  %s557_s27 = int_to_ptr.vmem [resolvable:$false] %s556_s27 }
  0x50   : > { %185 = vadd.xlane.f32.xlu0 %v184_v5  ;;  %p554_p7 = pnand %p553_p3, %p847_p11  ;;  %s558_s28 = scalar_lea.vmem %s557_s27, 1024 }
  0x51   : > { %p559_p10 = scmp.lt.s32.totalorder %s781_s17, %s557_s27  ;;  %p560_p2 = scmp.lt.s32.totalorder %s558_s28, %s552_s26 }
  0x52   : > { %p555_p12 = pneg %p554_p7 }
  0x53   : > { %p561_p13 = por %p560_p2, %p559_p10 }
  0x55   : > { %p562_p0 = pnand %p561_p13, %p555_p12 }
  0xd5   : > { %v183_v13 = vpop.xlane.xlu0 %182 }
  0xd6   : > { %v196_v17 = vrot.slane %v183_v13, %v195_v14 }
  0xd9   : > { %v186_v16 = vpop.xlane.xlu0 %185 }
  0xda   : > { %v201_v18 = vrot.slane %v186_v16, %v200_v15 }
  0xdc   : > { %v203_v19 = vsel %vm202_vm1, %v201_v18, %v196_v17 }
  0xdd   : > { %427 = vmatmul.mubr.msk.f32.vlgmr.msra.gmra.mxu0 %vm204_vm2, %v203_v19 }
 0x19d   : > { %v273_v20 = vpop.f32.mrf.mxu0 }
 0x19e   : > { %v411_v21 = vmul.f32 -1.442695, %v273_v20 }
 0x19f   : > { %v428_v22 = vpop.f32.mrf.mxu0 }
 0x1a0   : > { %494 = vpow2.f32 %v411_v21 }
 0x1ad   : > { %v495_v23 = vpop.eup %494 }
 0x1ae   : > { %v280_v24 = vadd.f32 1.0, %v495_v23 }
 0x1b0   : > { %496 = vrcp.f32 %v280_v24 }
 0x1bd   : > { %v497_v26 = vpop.eup %496 }
 0x1be   : > { %v286_v27 = vrot.slane %v497_v26, %v285_v25 }
 0x1c0   : > { %288 = vbcast.lane.b32.xlu1 %v286_v27, 256 }
 0x1c4   : > { %292 = vbcast.lane.b32.xlu1 %v286_v27, 264 }
 0x232   : > { %v289_v28 = vpop.permute.xlu1 %288 }
 0x233   : > { %v294_v29 = vmul.f32 %v289_v28, %v177_v0  ;;  %v295_v30 = vmul.f32 %v289_v28, %v178_v1 }
 0x235   : > { %298 = vst [vmem:[%s176_s15] sm:$0xff] %v294_v29  ;;  %299 = vst [vmem:[%s176_s15 + $0x8] sm:$0xff] %v295_v30 }
 0x236   : > { %v293_v31 = vpop.permute.xlu1 %292 }
 0x237   : > { %v296_v32 = vmul.f32 %v293_v31, %v179_v2  ;;  %v297_v33 = vmul.f32 %v293_v31, %v180_v4 }
 0x239   : > { %300 = vst [vmem:[%s176_s15 + $0x10] sm:$0xff] %v296_v32  ;;  %301 = vst [vmem:[%s176_s15 + $0x18] sm:$0xff] %v297_v33 }
 0x23a   : > { %565 = shalt.err (!%p562_p0)
}
 0x23b   : > { %s566_s3 = scalar_lea.hbm %s786_s20, 512  ;;  %s570_s6 = scalar_lea.hbm %s831_s2, 1024 }
 0x23c   : > { %p567_p5 = scmp.ne.s32.totalorder %s786_s20, %s566_s3  ;;  %p571_p4 = scmp.lt.s32.totalorder %s786_s20, %s831_s2 }
 0x23d   : > { %p572_p6 = scmp.lt.s32.totalorder %s570_s6, %s566_s3 }
 0x23e   : > { %p568_p9 = pnand %p567_p5, %p847_p11 }
 0x23f   : > { %p573_p8 = por %p572_p6, %p571_p4 }
 0x240   : > { %p569_p1 = pneg %p568_p9 }
 0x242   : > { %p574_p3 = pnand %p573_p8, %p569_p1 }
 0x244   : > { %577 = shalt.err (!%p574_p3)
}
 0x245   : > { %s631_s23 = smov 256   ;;  %s632_s24 = smov 16  }
 0x246   : > { %435 = dma.vmem_to_hbm [thread:$0]  (%p847_p11), %s781_s17, 512, %s786_s20, %s303_s25, %s631_s23, %s631_s23, %s632_s24  }
 0x247 PF: > { %s331_s15 = sand.u32 1, %s608_s9   ;;  %p848_p7 = scmp.ne.s32.totalorder %s837_s16, 0 }
 0x248   : > { %p849_p12 = scmp.ge.s32.totalorder %s620_s12, 2  ;;  %s332_s8 = scalar_lea.sflag [#allocation4], %s331_s15 }
 0x24a   : > { %p446_p10 = pnand %p849_p12, %p848_p7 }
 0x24c   : > { %p447_p2 = pneg %p446_p10 }
 0x24e   : > { %603 = dma.done.wait (%p447_p2), %s332_s8, 512  }
 0x24f   : > { %605 = vsyncadd (%p447_p2), %s332_s8, 4294966784  ;;  %p16_p13 = scmp.ge.s32.totalorder %s702_s21, 4   ;;  %s850_s9 = smov %s612_s10 }
 0x250   : > { %s851_s10 = smov %s616_s11  ;;  %s852_s11 = smov %s719_s29 }
 0x251   : > { %s853_s12 = smov %s702_s21  ;;  %18 = sbr.rel (!%p16_p13) target bundleno = 6 (0x6), region = 77 }
 0x256   :  { %337 = vsyncpa [#allocation3], 1 }
 0x257   :  { %339 = vsyncpa [#allocation3 + $0x1], 1 }
 0x258   :  { %340 = vsyncpa [#allocation6], 1 }
 0x259   :  { %341 = vsyncpa [#allocation4], 1 }
 0x25a   :  { %343 = vsyncpa [#allocation4 + $0x1], 1 }

</bundles_post_ra>
